<compile_context>
chip_gen: v6e
topology: v6e:2x2x1
jax: 0.10.0
libtpu: 0.0.40
codegen_flags: <defaults>
</compile_context>

<pallas_src>
import jax
import jax.numpy as jnp
from jax import lax
from jax.experimental import pallas as pl
from jax.experimental.pallas import tpu as pltpu

F_DIM = 28     # feature_dim
HID   = 25     # hidden_size
Z_DIM = 10     # z_dim
N_CLS = 100    # num_classes
BATCH = 8

LANES     = 128
CLS_LO    = LANES - N_CLS          # 28: class block occupies lanes 28..127
N_BANDS   = 10                     # packed (128,128) weight bands
BIAS_BASE = N_BANDS * LANES        # 1280
P_ROWS    = BIAS_BASE + 16         # 1296 (bias rows padded to a sublane multiple)


# ----------------------------------------------------------------------------- kernel
def vae_kernel(act_ref, p_ref, out_ref):
    f32 = jnp.float32
    x  = act_ref[:, 0:LANES]               # features in lanes 0..27, zeros elsewhere
    ug = act_ref[:, LANES:2 * LANES]       # gumbel uniforms in lanes 28..127
    ue = act_ref[:, 2 * LANES:3 * LANES]   # eps uniforms in lanes 10..19

    b = x.shape[0]
    lane = lax.broadcasted_iota(jnp.int32, (b, LANES), 1)
    cls_mask = lane >= CLS_LO
    lv_mask = (lane >= Z_DIM) & (lane < 2 * Z_DIM)

    def w(i):                              # (128,128) weight band i, tile-aligned view
        return p_ref[i * LANES:(i + 1) * LANES, :]

    def bias(i):                           # (1,128) bias row i
        return p_ref[BIAS_BASE + i:BIAS_BASE + i + 1, :]

    def fc(a, i):
        return jnp.dot(a, w(i), preferred_element_type=f32) + bias(i)

    relu = lambda v: jnp.maximum(v, 0.0)
    elu = lambda v: jnp.where(v > 0.0, v, jnp.exp(jnp.minimum(v, 0.0)) - 1.0)

    # ---- c_logits = net(x); stand-in classifier is a single Linear (-> lanes 28..127) ----
    # TODO(synk): the real `net` is an arbitrary external classifier passed into forward().
    c_logits = fc(x, 0)

    # ---- y_hat = gumbel_softmax(c_logits), tau=1, soft; padding lanes masked out ----
    gum = -jnp.log(-jnp.log(ug + 1e-20) + 1e-20)
    s = jnp.where(cls_mask, c_logits + gum, -1e30)
    s = s - jnp.max(s, axis=-1, keepdims=True)
    e = jnp.exp(s)
    y_hat = e * pl.reciprocal(jnp.sum(e, axis=-1, keepdims=True), approx=True)
    y_hat = jnp.where(cls_mask, y_hat, 0.0)          # lanes 0..27 exactly zero

    # ---- Z_Encoder: cat(x, y_hat) == x + y_hat (disjoint lanes) ----
    h = relu(fc(x + y_hat, 1))
    h = relu(fc(h, 2))
    mulv = elu(fc(h, 3))                             # mu -> lanes 0..9, logvar -> 10..19

    # ---- z = mu + eps * exp(0.5*logvar); eps ~ U[0,1) (torch.rand_like semantics) ----
    # z is never lane-aligned: mu stays in lanes 0..9, eps*std in lanes 10..19; weight
    # band 4 has its z-rows duplicated at rows 0..9 and 10..19 (linearity of matmul).
    eps_std = ue * jnp.exp(0.5 * jnp.where(lv_mask, mulv, 0.0))
    xd_in = jnp.where(lane < Z_DIM, mulv, 0.0) + eps_std + y_hat

    # ---- X_Decoder, then sigmoid ----
    h = relu(fc(xd_in, 4))
    h = relu(fc(h, 5))
    xh_logits = fc(h, 6)                             # lanes 0..27
    x_hat = pl.reciprocal(1.0 + jnp.exp(-xh_logits), approx=True)
    x_hat = jnp.where(lane < F_DIM, x_hat, 0.0)      # keep lanes 28..127 clear for the add

    # ---- T_Decoder: cat(x_hat, y_hat) == x_hat + y_hat ----
    h = relu(fc(x_hat + y_hat, 7))
    h = relu(fc(h, 8))
    n_logits = fc(h, 9)                              # lanes 0..99

    # ---- single lane-dense output slab (B, 5*128) ----
    out_ref[:, 0 * LANES:1 * LANES] = x_hat
    out_ref[:, 1 * LANES:2 * LANES] = n_logits
    out_ref[:, 2 * LANES:3 * LANES] = mulv
    out_ref[:, 3 * LANES:4 * LANES] = c_logits
    out_ref[:, 4 * LANES:5 * LANES] = y_hat


# --------------------------------------------------------------------- params & packing
def _linear_init(key, fan_in, fan_out):
    """PyTorch nn.Linear default init: U(-1/sqrt(fan_in), 1/sqrt(fan_in)); (in,out) layout."""
    kw, kb = jax.random.split(key)
    bound = 1.0 / float(fan_in) ** 0.5
    w = jax.random.uniform(kw, (fan_in, fan_out), jnp.float32, -bound, bound)
    b = jax.random.uniform(kb, (fan_out,), jnp.float32, -bound, bound)
    return w, b


def init_params(key):
    ks = jax.random.split(key, 11)
    p = {}
    p["wc"], p["bc"] = _linear_init(ks[0], F_DIM, N_CLS)               # `net` stand-in
    p["ze_w1"], p["ze_b1"] = _linear_init(ks[1], F_DIM + N_CLS, HID)   # fc1 on cat(x, y_hat)
    p["ze_wh"], p["ze_bh"] = _linear_init(ks[2], HID, HID)
    p["ze_wmu"], p["ze_bmu"] = _linear_init(ks[3], HID, Z_DIM)
    p["ze_wlv"], p["ze_blv"] = _linear_init(ks[4], HID, Z_DIM)
    p["xd_w1"], p["xd_b1"] = _linear_init(ks[5], Z_DIM + N_CLS, HID)   # fc1 on cat(z, y_hat)
    p["xd_wh"], p["xd_bh"] = _linear_init(ks[6], HID, HID)
    p["xd_w2"], p["xd_b2"] = _linear_init(ks[7], HID, F_DIM)
    p["td_w1"], p["td_b1"] = _linear_init(ks[8], F_DIM + N_CLS, HID)   # fc1 on cat(x_hat, y_hat)
    p["td_wh"], p["td_bh"] = _linear_init(ks[9], HID, HID)
    p["td_w2"], p["td_b2"] = _linear_init(ks[10], HID, N_CLS)
    return p


def pack_params(p):
    """Pack all weights/biases into one (1296, 128) f32 buffer: ten 128x128 bands + bias rows."""
    P = jnp.zeros((P_ROWS, LANES), jnp.float32)

    def setw(P, band, r0, c0, w):
        r, c = w.shape
        return P.at[band * LANES + r0:band * LANES + r0 + r, c0:c0 + c].set(w)

    def setb(P, i, c0, v):
        return P.at[BIAS_BASE + i, c0:c0 + v.shape[0]].set(v)

    P = setw(P, 0, 0, CLS_LO, p["wc"])               # classifier -> class lanes 28..127
    P = setw(P, 1, 0, 0, p["ze_w1"])                 # rows: [x(0..27) | y_hat(28..127)]
    P = setw(P, 2, 0, 0, p["ze_wh"])
    P = setw(P, 3, 0, 0, p["ze_wmu"])                # merged head: mu cols 0..9
    P = setw(P, 3, 0, Z_DIM, p["ze_wlv"])            #              logvar cols 10..19
    P = setw(P, 4, 0, 0, p["xd_w1"][:Z_DIM])         # z rows at 0..9 ...
    P = setw(P, 4, Z_DIM, 0, p["xd_w1"][:Z_DIM])     # ... duplicated at 10..19 (eps*std lanes)
    P = setw(P, 4, CLS_LO, 0, p["xd_w1"][Z_DIM:])    # y_hat rows at 28..127
    P = setw(P, 5, 0, 0, p["xd_wh"])
    P = setw(P, 6, 0, 0, p["xd_w2"])
    P = setw(P, 7, 0, 0, p["td_w1"])                 # rows: [x_hat(0..27) | y_hat(28..127)]
    P = setw(P, 8, 0, 0, p["td_wh"])
    P = setw(P, 9, 0, 0, p["td_w2"])

    P = setb(P, 0, CLS_LO, p["bc"])
    P = setb(P, 1, 0, p["ze_b1"])
    P = setb(P, 2, 0, p["ze_bh"])
    P = setb(P, 3, 0, p["ze_bmu"])
    P = setb(P, 3, Z_DIM, p["ze_blv"])
    P = setb(P, 4, 0, p["xd_b1"])
    P = setb(P, 5, 0, p["xd_bh"])
    P = setb(P, 6, 0, p["xd_b2"])
    P = setb(P, 7, 0, p["td_b1"])
    P = setb(P, 8, 0, p["td_bh"])
    P = setb(P, 9, 0, p["td_b2"])
    return P


# --------------------------------------------------------------------------- wrapper
@jax.jit
def base_vae_forward(x, u_gumbel, u_eps, packed_params):
    b = x.shape[0]
    f32 = jnp.float32
    # Layout plumbing only (lane placement); compute stays inside the kernel.
    act = jnp.zeros((b, 3 * LANES), f32)
    act = act.at[:, 0:F_DIM].set(x.astype(f32))                              # x lanes 0..27
    act = act.at[:, LANES + CLS_LO:2 * LANES].set(u_gumbel.astype(f32))      # ug lanes 28..127
    act = act.at[:, 2 * LANES + Z_DIM:2 * LANES + 2 * Z_DIM].set(u_eps.astype(f32))  # ue 10..19

    # No grid: whole problem (<1.5 MiB incl. double-buffering) fits VMEM as single blocks.
    out = pl.pallas_call(
        vae_kernel,
        out_shape=jax.ShapeDtypeStruct((b, 5 * LANES), f32),
        in_specs=[pl.BlockSpec(memory_space=pltpu.MemorySpace.VMEM),
                  pl.BlockSpec(memory_space=pltpu.MemorySpace.VMEM)],
        out_specs=pl.BlockSpec(memory_space=pltpu.MemorySpace.VMEM),
    )(act, packed_params)

    x_hat    = out[:, 0:F_DIM]
    n_logits = out[:, LANES:LANES + N_CLS]
    mu       = out[:, 2 * LANES:2 * LANES + Z_DIM]
    logvar   = out[:, 2 * LANES + Z_DIM:2 * LANES + 2 * Z_DIM]
    c_logits = out[:, 3 * LANES + CLS_LO:4 * LANES]
    y_hat    = out[:, 4 * LANES + CLS_LO:5 * LANES]
    return x_hat, n_logits, mu, logvar, c_logits, y_hat


# ------------------------------------------------------------------- pure-JAX reference
def ref_forward(x, u_gumbel, u_eps, p):
    hp = lax.Precision.HIGHEST
    dot = lambda a, w: jnp.dot(a, w, precision=hp)
    relu = jax.nn.relu
    elu = lambda v: jnp.where(v > 0, v, jnp.expm1(jnp.minimum(v, 0.0)))

    c_logits = dot(x, p["wc"]) + p["bc"]
    g = -jnp.log(-jnp.log(u_gumbel + 1e-20) + 1e-20)
    y_hat = jax.nn.softmax(c_logits + g, axis=-1)

    h = relu(dot(jnp.concatenate([x, y_hat], -1), p["ze_w1"]) + p["ze_b1"])
    h = relu(dot(h, p["ze_wh"]) + p["ze_bh"])
    mu = elu(dot(h, p["ze_wmu"]) + p["ze_bmu"])
    logvar = elu(dot(h, p["ze_wlv"]) + p["ze_blv"])
    z = mu + u_eps * jnp.exp(0.5 * logvar)

    h = relu(dot(jnp.concatenate([z, y_hat], -1), p["xd_w1"]) + p["xd_b1"])
    h = relu(dot(h, p["xd_wh"]) + p["xd_bh"])
    x_hat = jax.nn.sigmoid(dot(h, p["xd_w2"]) + p["xd_b2"])

    h = relu(dot(jnp.concatenate([x_hat, y_hat], -1), p["td_w1"]) + p["td_b1"])
    h = relu(dot(h, p["td_wh"]) + p["td_bh"])
    n_logits = dot(h, p["td_w2"]) + p["td_b2"]
    return x_hat, n_logits, mu, logvar, c_logits, y_hat


if __name__ == "__main__":
    key = jax.random.PRNGKey(0)
    k_param, k_x, k_g, k_e = jax.random.split(key, 4)

    params = init_params(k_param)
    packed = pack_params(params)

    x = jax.random.uniform(k_x, (BATCH, F_DIM), jnp.float32)          # features in [0,1)
    u_gumbel = jax.random.uniform(k_g, (BATCH, N_CLS), jnp.float32)   # gumbel-softmax uniforms
    u_eps = jax.random.uniform(k_e, (BATCH, Z_DIM), jnp.float32)      # torch.rand_like eps

    outs = jax.block_until_ready(base_vae_forward(x, u_gumbel, u_eps, packed))
    x_hat, n_logits, mu, logvar, c_logits, y_hat = outs

    # shape / sanity checks
    assert x_hat.shape == (BATCH, F_DIM)
    assert n_logits.shape == (BATCH, N_CLS)
    assert mu.shape == (BATCH, Z_DIM) and logvar.shape == (BATCH, Z_DIM)
    assert c_logits.shape == (BATCH, N_CLS) and y_hat.shape == (BATCH, N_CLS)
    for o in outs:
        assert bool(jnp.all(jnp.isfinite(o)))
    assert bool(jnp.allclose(jnp.sum(y_hat, axis=-1), 1.0, atol=1e-2))
    # approx-reciprocal sigmoid can overshoot [0,1] by ~2^-12 relative; allow tiny slack
    assert bool(jnp.all((x_hat >= -1e-4) & (x_hat <= 1.0 + 1e-4)))

    # cross-check the fused/packed kernel against a plain-JAX reference of the torch forward
    refs = ref_forward(x, u_gumbel, u_eps, params)
    names = ["x_hat", "n_logits", "mu", "logvar", "c_logits", "y_hat"]
    for name, got, want in zip(names, outs, refs):
        assert bool(jnp.allclose(got, want, atol=2e-2, rtol=2e-2)), name

    print("KERNEL_OK")
</pallas_src>

<mosaic_0001>
module attributes {stable_mosaic.version = 11 : i64} {
  func.func @vae_kernel(%arg0: memref<8x384xf32, #tpu.memory_space<vmem>>, %arg1: memref<1296x128xf32, #tpu.memory_space<vmem>>, %arg2: memref<8x640xf32, #tpu.memory_space<vmem>>) attributes {dimension_semantics = [], scalar_prefetch = 0 : i64, scratch_operands = 0 : i64, tpu.core_type = #tpu.core_type<tc>} {
    %c0 = arith.constant 0 : index
    %c0_0 = arith.constant 0 : index
    %0 = vector.load %arg0[%c0, %c0_0] : memref<8x384xf32, #tpu.memory_space<vmem>>, vector<8x128xf32>
    %c0_1 = arith.constant 0 : index
    %c128 = arith.constant 128 : index
    %1 = vector.load %arg0[%c0_1, %c128] : memref<8x384xf32, #tpu.memory_space<vmem>>, vector<8x128xf32>
    %c0_2 = arith.constant 0 : index
    %c256 = arith.constant 256 : index
    %2 = vector.load %arg0[%c0_2, %c256] : memref<8x384xf32, #tpu.memory_space<vmem>>, vector<8x128xf32>
    %3 = tpu.iota {dimensions = array<i32: 1>} : vector<8x128xi32>
    %c28_i32 = arith.constant 28 : i32
    %4 = vector.broadcast %c28_i32 : i32 to vector<8x128xi32>
    %5 = arith.cmpi sge, %3, %4 : vector<8x128xi32>
    %c10_i32 = arith.constant 10 : i32
    %6 = vector.broadcast %c10_i32 : i32 to vector<8x128xi32>
    %7 = arith.cmpi sge, %3, %6 : vector<8x128xi32>
    %c20_i32 = arith.constant 20 : i32
    %8 = vector.broadcast %c20_i32 : i32 to vector<8x128xi32>
    %9 = arith.cmpi slt, %3, %8 : vector<8x128xi32>
    %10 = arith.andi %7, %9 : vector<8x128xi1>
    %c0_3 = arith.constant 0 : index
    %c0_4 = arith.constant 0 : index
    %11 = vector.load %arg1[%c0_3, %c0_4] : memref<1296x128xf32, #tpu.memory_space<vmem>>, vector<128x128xf32>
    %cst = arith.constant dense<0.000000e+00> : vector<8x128xf32>
    %12 = tpu.matmul %0, %11, %cst {dimension_numbers = #tpu.dot_dimension_numbers<[1], [0], [0], [1], [0, 0, 1, 1], [], []>} : vector<8x128xf32>, vector<128x128xf32>, vector<8x128xf32> -> vector<8x128xf32>
    %c1280 = arith.constant 1280 : index
    %c0_5 = arith.constant 0 : index
    %13 = vector.load %arg1[%c1280, %c0_5] : memref<1296x128xf32, #tpu.memory_space<vmem>>, vector<1x128xf32>
    %14 = vector.broadcast %13 : vector<1x128xf32> to vector<8x128xf32>
    %15 = arith.addf %12, %14 : vector<8x128xf32>
    %cst_6 = arith.constant 9.99999968E-21 : f32
    %16 = vector.broadcast %cst_6 : f32 to vector<8x128xf32>
    %17 = arith.addf %1, %16 : vector<8x128xf32>
    %18 = math.log %17 : vector<8x128xf32>
    %cst_7 = arith.constant 0.000000e+00 : f32
    %19 = vector.broadcast %cst_7 : f32 to vector<8x128xf32>
    %20 = arith.subf %19, %18 : vector<8x128xf32>
    %cst_8 = arith.constant 9.99999968E-21 : f32
    %21 = vector.broadcast %cst_8 : f32 to vector<8x128xf32>
    %22 = arith.addf %20, %21 : vector<8x128xf32>
    %23 = math.log %22 : vector<8x128xf32>
    %cst_9 = arith.constant 0.000000e+00 : f32
    %24 = vector.broadcast %cst_9 : f32 to vector<8x128xf32>
    %25 = arith.subf %24, %23 : vector<8x128xf32>
    %26 = arith.addf %15, %25 : vector<8x128xf32>
    %cst_10 = arith.constant -1.000000e+30 : f32
    %27 = vector.broadcast %cst_10 : f32 to vector<8x128xf32>
    %28 = arith.select %5, %26, %27 : vector<8x128xi1>, vector<8x128xf32>
    %cst_11 = arith.constant dense<0xFF800000> : vector<8xf32>
    %29 = vector.multi_reduction <maximumf>, %28, %cst_11 [1] : vector<8x128xf32> to vector<8xf32>
    %30 = vector.shape_cast %29 : vector<8xf32> to vector<8x1xf32>
    %31 = vector.broadcast %30 : vector<8x1xf32> to vector<8x128xf32>
    %32 = arith.subf %28, %31 : vector<8x128xf32>
    %33 = math.exp %32 : vector<8x128xf32>
    %cst_12 = arith.constant dense<0.000000e+00> : vector<8xf32>
    %34 = vector.multi_reduction <add>, %33, %cst_12 [1] : vector<8x128xf32> to vector<8xf32>
    %35 = vector.shape_cast %34 : vector<8xf32> to vector<8x1xf32>
    %36 = tpu.reciprocal %35 {approx = true} : vector<8x1xf32> -> vector<8x1xf32>
    %37 = vector.broadcast %36 : vector<8x1xf32> to vector<8x128xf32>
    %38 = arith.mulf %33, %37 : vector<8x128xf32>
    %cst_13 = arith.constant 0.000000e+00 : f32
    %39 = vector.broadcast %cst_13 : f32 to vector<8x128xf32>
    %40 = arith.select %5, %38, %39 : vector<8x128xi1>, vector<8x128xf32>
    %41 = arith.addf %0, %40 : vector<8x128xf32>
    %c128_14 = arith.constant 128 : index
    %c0_15 = arith.constant 0 : index
    %42 = vector.load %arg1[%c128_14, %c0_15] : memref<1296x128xf32, #tpu.memory_space<vmem>>, vector<128x128xf32>
    %cst_16 = arith.constant dense<0.000000e+00> : vector<8x128xf32>
    %43 = tpu.matmul %41, %42, %cst_16 {dimension_numbers = #tpu.dot_dimension_numbers<[1], [0], [0], [1], [0, 0, 1, 1], [], []>} : vector<8x128xf32>, vector<128x128xf32>, vector<8x128xf32> -> vector<8x128xf32>
    %c1281 = arith.constant 1281 : index
    %c0_17 = arith.constant 0 : index
    %44 = vector.load %arg1[%c1281, %c0_17] : memref<1296x128xf32, #tpu.memory_space<vmem>>, vector<1x128xf32>
    %45 = vector.broadcast %44 : vector<1x128xf32> to vector<8x128xf32>
    %46 = arith.addf %43, %45 : vector<8x128xf32>
    %cst_18 = arith.constant 0.000000e+00 : f32
    %47 = vector.broadcast %cst_18 : f32 to vector<8x128xf32>
    %48 = arith.maximumf %46, %47 : vector<8x128xf32>
    %c256_19 = arith.constant 256 : index
    %c0_20 = arith.constant 0 : index
    %49 = vector.load %arg1[%c256_19, %c0_20] : memref<1296x128xf32, #tpu.memory_space<vmem>>, vector<128x128xf32>
    %cst_21 = arith.constant dense<0.000000e+00> : vector<8x128xf32>
    %50 = tpu.matmul %48, %49, %cst_21 {dimension_numbers = #tpu.dot_dimension_numbers<[1], [0], [0], [1], [0, 0, 1, 1], [], []>} : vector<8x128xf32>, vector<128x128xf32>, vector<8x128xf32> -> vector<8x128xf32>
    %c1282 = arith.constant 1282 : index
    %c0_22 = arith.constant 0 : index
    %51 = vector.load %arg1[%c1282, %c0_22] : memref<1296x128xf32, #tpu.memory_space<vmem>>, vector<1x128xf32>
    %52 = vector.broadcast %51 : vector<1x128xf32> to vector<8x128xf32>
    %53 = arith.addf %50, %52 : vector<8x128xf32>
    %cst_23 = arith.constant 0.000000e+00 : f32
    %54 = vector.broadcast %cst_23 : f32 to vector<8x128xf32>
    %55 = arith.maximumf %53, %54 : vector<8x128xf32>
    %c384 = arith.constant 384 : index
    %c0_24 = arith.constant 0 : index
    %56 = vector.load %arg1[%c384, %c0_24] : memref<1296x128xf32, #tpu.memory_space<vmem>>, vector<128x128xf32>
    %cst_25 = arith.constant dense<0.000000e+00> : vector<8x128xf32>
    %57 = tpu.matmul %55, %56, %cst_25 {dimension_numbers = #tpu.dot_dimension_numbers<[1], [0], [0], [1], [0, 0, 1, 1], [], []>} : vector<8x128xf32>, vector<128x128xf32>, vector<8x128xf32> -> vector<8x128xf32>
    %c1283 = arith.constant 1283 : index
    %c0_26 = arith.constant 0 : index
    %58 = vector.load %arg1[%c1283, %c0_26] : memref<1296x128xf32, #tpu.memory_space<vmem>>, vector<1x128xf32>
    %59 = vector.broadcast %58 : vector<1x128xf32> to vector<8x128xf32>
    %60 = arith.addf %57, %59 : vector<8x128xf32>
    %cst_27 = arith.constant 0.000000e+00 : f32
    %61 = vector.broadcast %cst_27 : f32 to vector<8x128xf32>
    %62 = arith.cmpf ogt, %60, %61 : vector<8x128xf32>
    %cst_28 = arith.constant 0.000000e+00 : f32
    %63 = vector.broadcast %cst_28 : f32 to vector<8x128xf32>
    %64 = arith.minimumf %60, %63 : vector<8x128xf32>
    %65 = math.exp %64 : vector<8x128xf32>
    %cst_29 = arith.constant 1.000000e+00 : f32
    %66 = vector.broadcast %cst_29 : f32 to vector<8x128xf32>
    %67 = arith.subf %65, %66 : vector<8x128xf32>
    %68 = arith.select %62, %60, %67 : vector<8x128xi1>, vector<8x128xf32>
    %cst_30 = arith.constant 0.000000e+00 : f32
    %69 = vector.broadcast %cst_30 : f32 to vector<8x128xf32>
    %70 = arith.select %10, %68, %69 : vector<8x128xi1>, vector<8x128xf32>
    %cst_31 = arith.constant 5.000000e-01 : f32
    %71 = vector.broadcast %cst_31 : f32 to vector<8x128xf32>
    %72 = arith.mulf %71, %70 : vector<8x128xf32>
    %73 = math.exp %72 : vector<8x128xf32>
    %74 = arith.mulf %2, %73 : vector<8x128xf32>
    %c10_i32_32 = arith.constant 10 : i32
    %75 = vector.broadcast %c10_i32_32 : i32 to vector<8x128xi32>
    %76 = arith.cmpi slt, %3, %75 : vector<8x128xi32>
    %cst_33 = arith.constant 0.000000e+00 : f32
    %77 = vector.broadcast %cst_33 : f32 to vector<8x128xf32>
    %78 = arith.select %76, %68, %77 : vector<8x128xi1>, vector<8x128xf32>
    %79 = arith.addf %78, %74 : vector<8x128xf32>
    %80 = arith.addf %79, %40 : vector<8x128xf32>
    %c512 = arith.constant 512 : index
    %c0_34 = arith.constant 0 : index
    %81 = vector.load %arg1[%c512, %c0_34] : memref<1296x128xf32, #tpu.memory_space<vmem>>, vector<128x128xf32>
    %cst_35 = arith.constant dense<0.000000e+00> : vector<8x128xf32>
    %82 = tpu.matmul %80, %81, %cst_35 {dimension_numbers = #tpu.dot_dimension_numbers<[1], [0], [0], [1], [0, 0, 1, 1], [], []>} : vector<8x128xf32>, vector<128x128xf32>, vector<8x128xf32> -> vector<8x128xf32>
    %c1284 = arith.constant 1284 : index
    %c0_36 = arith.constant 0 : index
    %83 = vector.load %arg1[%c1284, %c0_36] : memref<1296x128xf32, #tpu.memory_space<vmem>>, vector<1x128xf32>
    %84 = vector.broadcast %83 : vector<1x128xf32> to vector<8x128xf32>
    %85 = arith.addf %82, %84 : vector<8x128xf32>
    %cst_37 = arith.constant 0.000000e+00 : f32
    %86 = vector.broadcast %cst_37 : f32 to vector<8x128xf32>
    %87 = arith.maximumf %85, %86 : vector<8x128xf32>
    %c640 = arith.constant 640 : index
    %c0_38 = arith.constant 0 : index
    %88 = vector.load %arg1[%c640, %c0_38] : memref<1296x128xf32, #tpu.memory_space<vmem>>, vector<128x128xf32>
    %cst_39 = arith.constant dense<0.000000e+00> : vector<8x128xf32>
    %89 = tpu.matmul %87, %88, %cst_39 {dimension_numbers = #tpu.dot_dimension_numbers<[1], [0], [0], [1], [0, 0, 1, 1], [], []>} : vector<8x128xf32>, vector<128x128xf32>, vector<8x128xf32> -> vector<8x128xf32>
    %c1285 = arith.constant 1285 : index
    %c0_40 = arith.constant 0 : index
    %90 = vector.load %arg1[%c1285, %c0_40] : memref<1296x128xf32, #tpu.memory_space<vmem>>, vector<1x128xf32>
    %91 = vector.broadcast %90 : vector<1x128xf32> to vector<8x128xf32>
    %92 = arith.addf %89, %91 : vector<8x128xf32>
    %cst_41 = arith.constant 0.000000e+00 : f32
    %93 = vector.broadcast %cst_41 : f32 to vector<8x128xf32>
    %94 = arith.maximumf %92, %93 : vector<8x128xf32>
    %c768 = arith.constant 768 : index
    %c0_42 = arith.constant 0 : index
    %95 = vector.load %arg1[%c768, %c0_42] : memref<1296x128xf32, #tpu.memory_space<vmem>>, vector<128x128xf32>
    %cst_43 = arith.constant dense<0.000000e+00> : vector<8x128xf32>
    %96 = tpu.matmul %94, %95, %cst_43 {dimension_numbers = #tpu.dot_dimension_numbers<[1], [0], [0], [1], [0, 0, 1, 1], [], []>} : vector<8x128xf32>, vector<128x128xf32>, vector<8x128xf32> -> vector<8x128xf32>
    %c1286 = arith.constant 1286 : index
    %c0_44 = arith.constant 0 : index
    %97 = vector.load %arg1[%c1286, %c0_44] : memref<1296x128xf32, #tpu.memory_space<vmem>>, vector<1x128xf32>
    %98 = vector.broadcast %97 : vector<1x128xf32> to vector<8x128xf32>
    %99 = arith.addf %96, %98 : vector<8x128xf32>
    %cst_45 = arith.constant 0.000000e+00 : f32
    %100 = vector.broadcast %cst_45 : f32 to vector<8x128xf32>
    %101 = arith.subf %100, %99 : vector<8x128xf32>
    %102 = math.exp %101 : vector<8x128xf32>
    %cst_46 = arith.constant 1.000000e+00 : f32
    %103 = vector.broadcast %cst_46 : f32 to vector<8x128xf32>
    %104 = arith.addf %103, %102 : vector<8x128xf32>
    %105 = tpu.reciprocal %104 {approx = true} : vector<8x128xf32> -> vector<8x128xf32>
    %c28_i32_47 = arith.constant 28 : i32
    %106 = vector.broadcast %c28_i32_47 : i32 to vector<8x128xi32>
    %107 = arith.cmpi slt, %3, %106 : vector<8x128xi32>
    %cst_48 = arith.constant 0.000000e+00 : f32
    %108 = vector.broadcast %cst_48 : f32 to vector<8x128xf32>
    %109 = arith.select %107, %105, %108 : vector<8x128xi1>, vector<8x128xf32>
    %110 = arith.addf %109, %40 : vector<8x128xf32>
    %c896 = arith.constant 896 : index
    %c0_49 = arith.constant 0 : index
    %111 = vector.load %arg1[%c896, %c0_49] : memref<1296x128xf32, #tpu.memory_space<vmem>>, vector<128x128xf32>
    %cst_50 = arith.constant dense<0.000000e+00> : vector<8x128xf32>
    %112 = tpu.matmul %110, %111, %cst_50 {dimension_numbers = #tpu.dot_dimension_numbers<[1], [0], [0], [1], [0, 0, 1, 1], [], []>} : vector<8x128xf32>, vector<128x128xf32>, vector<8x128xf32> -> vector<8x128xf32>
    %c1287 = arith.constant 1287 : index
    %c0_51 = arith.constant 0 : index
    %113 = vector.load %arg1[%c1287, %c0_51] : memref<1296x128xf32, #tpu.memory_space<vmem>>, vector<1x128xf32>
    %114 = vector.broadcast %113 : vector<1x128xf32> to vector<8x128xf32>
    %115 = arith.addf %112, %114 : vector<8x128xf32>
    %cst_52 = arith.constant 0.000000e+00 : f32
    %116 = vector.broadcast %cst_52 : f32 to vector<8x128xf32>
    %117 = arith.maximumf %115, %116 : vector<8x128xf32>
    %c1024 = arith.constant 1024 : index
    %c0_53 = arith.constant 0 : index
    %118 = vector.load %arg1[%c1024, %c0_53] : memref<1296x128xf32, #tpu.memory_space<vmem>>, vector<128x128xf32>
    %cst_54 = arith.constant dense<0.000000e+00> : vector<8x128xf32>
    %119 = tpu.matmul %117, %118, %cst_54 {dimension_numbers = #tpu.dot_dimension_numbers<[1], [0], [0], [1], [0, 0, 1, 1], [], []>} : vector<8x128xf32>, vector<128x128xf32>, vector<8x128xf32> -> vector<8x128xf32>
    %c1288 = arith.constant 1288 : index
    %c0_55 = arith.constant 0 : index
    %120 = vector.load %arg1[%c1288, %c0_55] : memref<1296x128xf32, #tpu.memory_space<vmem>>, vector<1x128xf32>
    %121 = vector.broadcast %120 : vector<1x128xf32> to vector<8x128xf32>
    %122 = arith.addf %119, %121 : vector<8x128xf32>
    %cst_56 = arith.constant 0.000000e+00 : f32
    %123 = vector.broadcast %cst_56 : f32 to vector<8x128xf32>
    %124 = arith.maximumf %122, %123 : vector<8x128xf32>
    %c1152 = arith.constant 1152 : index
    %c0_57 = arith.constant 0 : index
    %125 = vector.load %arg1[%c1152, %c0_57] : memref<1296x128xf32, #tpu.memory_space<vmem>>, vector<128x128xf32>
    %cst_58 = arith.constant dense<0.000000e+00> : vector<8x128xf32>
    %126 = tpu.matmul %124, %125, %cst_58 {dimension_numbers = #tpu.dot_dimension_numbers<[1], [0], [0], [1], [0, 0, 1, 1], [], []>} : vector<8x128xf32>, vector<128x128xf32>, vector<8x128xf32> -> vector<8x128xf32>
    %c1289 = arith.constant 1289 : index
    %c0_59 = arith.constant 0 : index
    %127 = vector.load %arg1[%c1289, %c0_59] : memref<1296x128xf32, #tpu.memory_space<vmem>>, vector<1x128xf32>
    %128 = vector.broadcast %127 : vector<1x128xf32> to vector<8x128xf32>
    %129 = arith.addf %126, %128 : vector<8x128xf32>
    %c0_60 = arith.constant 0 : index
    %c0_61 = arith.constant 0 : index
    %130 = vector.load %arg2[%c0_60, %c0_61] : memref<8x640xf32, #tpu.memory_space<vmem>>, vector<8x128xf32>
    tpu.vector_store %arg2[%c0_60, %c0_61], %109 {strides = array<i32>} : memref<8x640xf32, #tpu.memory_space<vmem>>, vector<8x128xf32>,
    %c0_62 = arith.constant 0 : index
    %c128_63 = arith.constant 128 : index
    %131 = vector.load %arg2[%c0_62, %c128_63] : memref<8x640xf32, #tpu.memory_space<vmem>>, vector<8x128xf32>
    tpu.vector_store %arg2[%c0_62, %c128_63], %129 {strides = array<i32>} : memref<8x640xf32, #tpu.memory_space<vmem>>, vector<8x128xf32>,
    %c0_64 = arith.constant 0 : index
    %c256_65 = arith.constant 256 : index
    %132 = vector.load %arg2[%c0_64, %c256_65] : memref<8x640xf32, #tpu.memory_space<vmem>>, vector<8x128xf32>
    tpu.vector_store %arg2[%c0_64, %c256_65], %68 {strides = array<i32>} : memref<8x640xf32, #tpu.memory_space<vmem>>, vector<8x128xf32>,
    %c0_66 = arith.constant 0 : index
    %c384_67 = arith.constant 384 : index
    %133 = vector.load %arg2[%c0_66, %c384_67] : memref<8x640xf32, #tpu.memory_space<vmem>>, vector<8x128xf32>
    tpu.vector_store %arg2[%c0_66, %c384_67], %15 {strides = array<i32>} : memref<8x640xf32, #tpu.memory_space<vmem>>, vector<8x128xf32>,
    %c0_68 = arith.constant 0 : index
    %c512_69 = arith.constant 512 : index
    %134 = vector.load %arg2[%c0_68, %c512_69] : memref<8x640xf32, #tpu.memory_space<vmem>>, vector<8x128xf32>
    tpu.vector_store %arg2[%c0_68, %c512_69], %40 {strides = array<i32>} : memref<8x640xf32, #tpu.memory_space<vmem>>, vector<8x128xf32>,
    return
  }
}

</mosaic_0001>

<bundles_post_ra>
// kernel: base_vae_forward.1
= control target key start
LH: loop header
LB: loop body
LE: loop exit
PB: predicated region body
PF: predicated region fallthrough
CT: control target
= control target key end

     0   :  { %7 = vsyncpa [#allocation3], 0  ;;  %s1578_s9 = smov [#allocation2]   ;;  %s1830_s0 = inlined_call_operand.vmem [shape: f32[8,384], index: 0, kind: input, shape index: {}]   ;;  %s1831_s1 = inlined_call_operand.hbm [shape: f32[1296,128], index: 1, kind: input, shape index: {}]   ;;  %s1832_s2 = inlined_call_operand.vmem [shape: f32[8,640], index: 2, kind: output, shape index: {}]  }
   0x1   :  { %s15_s10 = sshll.u32 %s1578_s9, 4  ;;  %s16_s10 = int_to_ptr.vmem [resolvable:$true] %s15_s10 }
   0x2   :  { %s1564_s11 = scalar_lea.vmem %s16_s10, 20736  ;;  %p1569_p1 = scmp.lt.s32.totalorder %s16_s10, %s16_s10 }
   0x3   :  { %p1565_p0 = scmp.ne.s32.totalorder %s16_s10, %s1564_s11  ;;  %p1570_p2 = scmp.lt.s32.totalorder %s1564_s11, %s1564_s11 }
   0x5   :  { %p1571_p3 = por %p1570_p2, %p1569_p1 }
   0x7   :  { %p1572_p4 = pnand %p1571_p3, %p1565_p0 }
   0x9   :  { %1575 = shalt.err (!%p1572_p4)
}
   0xa   :  { %s1579_s12 = smov 128   ;;  %s1580_s13 = smov 8  }
   0xb   :  { %21 = dma.hbm_to_vmem [thread:$0]  %s1831_s1, 20736, %s16_s10, [#allocation3], %s1579_s12, %s1579_s12, %s1580_s13  }
   0xc   :  { %1576 = dma.done.wait [#allocation3], 20736  }
   0xd   :  { %1577 = vsyncadd [#allocation3], 4294946560  ;;  %v1581_v0 = vmov 0.0   ;;  %vm1582_vm0 = vmmov 0   ;;  %v49_v1 = vld [vmem:[#allocation2 + $0x78] sm:$0xff]  ;;  %v48_v2 = vld [vmem:[#allocation2 + $0x70] sm:$0xff]  ;;  %v28_v25 = vlaneseq }
   0xe   :  { %1185 = vmatprep.subr.mxu0 %v1581_v0  ;;  %1217 = vmatprep.mubr.msk.f32.mxu0 %vm1582_vm0, %v1581_v0  ;;  %v47_v3 = vld [vmem:[#allocation2 + $0x68] sm:$0xff]  ;;  %v46_v4 = vld [vmem:[#allocation2 + $0x60] sm:$0xff]  ;;  %v45_v5 = vld [vmem:[#allocation2 + $0x58] sm:$0xff] }
   0xf   :  { %1220 = vmatprep.subr.mxu1 %v1581_v0  ;;  %1252 = vmatprep.mubr.msk.f32.mxu1 %vm1582_vm0, %v1581_v0  ;;  %v44_v6 = vld [vmem:[#allocation2 + $0x50] sm:$0xff]  ;;  %v43_v7 = vld [vmem:[#allocation2 + $0x48] sm:$0xff]  ;;  %v42_v8 = vld [vmem:[#allocation2 + $0x40] sm:$0xff]  ;;  %v1634_v28 = vand.u32 127, %v28_v25 }
  0x10   :  { %1186 = vmatpush3.msra.mxu0 %v49_v1  ;;  %v41_v9 = vld [vmem:[#allocation2 + $0x38] sm:$0xff]  ;;  %v40_v10 = vld [vmem:[#allocation2 + $0x30] sm:$0xff]  ;;  %v39_v11 = vld [vmem:[#allocation2 + $0x28] sm:$0xff] }
  0x11   :  { %1187 = vmatprep.subr.mxu0 %v1581_v0  ;;  %v38_v12 = vld [vmem:[#allocation2 + $0x20] sm:$0xff]  ;;  %v37_v13 = vld [vmem:[#allocation2 + $0x18] sm:$0xff]  ;;  %v36_v14 = vld [vmem:[#allocation2 + $0x10] sm:$0xff]  ;;  %vm30_vm1 = vcmp.ge.s32.totalorder %v1634_v28, 28  ;;  %vm31_vm2 = vcmp.ge.s32.totalorder %v1634_v28, 10  ;;  %vm32_vm3 = vcmp.lt.s32.totalorder %v1634_v28, 20 }
  0x12   :  { %1188 = vmatpush3.msra.mxu0 %v48_v2  ;;  %v35_v15 = vld [vmem:[#allocation2 + $0x8] sm:$0xff]  ;;  %v34_v16 = vld [vmem:[#allocation2] sm:$0xff]  ;;  %v161_v35 = vld [vmem:[#allocation2 + $0xf8] sm:$0xff]  ;;  %vm432_vm6 = vcmp.lt.s32.totalorder %v1634_v28, 10  ;;  %vm716_vm7 = vcmp.lt.s32.totalorder %v1634_v28, 28 }
  0x13   :  { %1189 = vmatprep.subr.mxu0 %v1581_v0  ;;  %v1624_v17 = vld [vmem:[%s1830_s0] sm:$0xff]  ;;  %v26_v18 = vld [vmem:[%s1830_s0 + $0x8] sm:$0xff]  ;;  %v160_v36 = vld [vmem:[#allocation2 + $0xf0] sm:$0xff]  ;;  %1221 = vmatpush3.msra.mxu1 %v161_v35 }
  0x14   :  { %1190 = vmatpush3.msra.mxu0 %v47_v3  ;;  %v125_v19 = vadd.f32 1e-20, %v26_v18  ;;  %v1004_v27 = vld [vmem:[#allocation2 + $0x500] ss:$0 sm:$0xff]  ;;  %1222 = vmatprep.subr.mxu1 %v1581_v0  ;;  %v159_v37 = vld [vmem:[#allocation2 + $0xe8] sm:$0xff]  ;;  %v157_v39 = vld [vmem:[#allocation2 + $0xd8] sm:$0xff] }
  0x15   :  { %1191 = vmatprep.subr.mxu0 %v1581_v0  ;;  %1223 = vmatpush3.msra.mxu1 %v160_v36  ;;  %v158_v38 = vld [vmem:[#allocation2 + $0xe0] sm:$0xff]  ;;  %v156_v40 = vld [vmem:[#allocation2 + $0xd0] sm:$0xff]  ;;  %v155_v45 = vld [vmem:[#allocation2 + $0xc8] sm:$0xff] }
  0x16   :  { %1192 = vmatpush3.msra.mxu0 %v46_v4  ;;  %1540 = vlog2.f32 %v125_v19  ;;  %1224 = vmatprep.subr.mxu1 %v1581_v0  ;;  %v154_v46 = vld [vmem:[#allocation2 + $0xc0] sm:$0xff]  ;;  %v153_v47 = vld [vmem:[#allocation2 + $0xb8] sm:$0xff]  ;;  %v152_v48 = vld [vmem:[#allocation2 + $0xb0] sm:$0xff] }
  0x17   :  { %1193 = vmatprep.subr.mxu0 %v1581_v0  ;;  %1225 = vmatpush3.msra.mxu1 %v159_v37  ;;  %v151_v49 = vld [vmem:[#allocation2 + $0xa8] sm:$0xff]  ;;  %v150_v50 = vld [vmem:[#allocation2 + $0xa0] sm:$0xff]  ;;  %v149_v51 = vld [vmem:[#allocation2 + $0x98] sm:$0xff] }
  0x18   :  { %1194 = vmatpush3.msra.mxu0 %v45_v5  ;;  %1226 = vmatprep.subr.mxu1 %v1581_v0  ;;  %v148_v52 = vld [vmem:[#allocation2 + $0x90] sm:$0xff]  ;;  %v147_v53 = vld [vmem:[#allocation2 + $0x88] sm:$0xff]  ;;  %v146_v54 = vld [vmem:[#allocation2 + $0x80] sm:$0xff] }
  0x19   :  { %1195 = vmatprep.subr.mxu0 %v1581_v0  ;;  %1227 = vmatpush3.msra.mxu1 %v158_v38  ;;  %v253_v55 = vld [vmem:[#allocation2 + $0x178] sm:$0xff]  ;;  %v252_v56 = vld [vmem:[#allocation2 + $0x170] sm:$0xff]  ;;  %v251_v57 = vld [vmem:[#allocation2 + $0x168] sm:$0xff] }
  0x1a   :  { %1196 = vmatpush3.msra.mxu0 %v44_v6  ;;  %1228 = vmatprep.subr.mxu1 %v1581_v0  ;;  %v250_v58 = vld [vmem:[#allocation2 + $0x160] sm:$0xff]  ;;  %v249_v59 = vld [vmem:[#allocation2 + $0x158] sm:$0xff]  ;;  %v248_v60 = vld [vmem:[#allocation2 + $0x150] sm:$0xff] }
  0x1b   :  { %1197 = vmatprep.subr.mxu0 %v1581_v0  ;;  %1229 = vmatpush3.msra.mxu1 %v157_v39  ;;  %v247_v61 = vld [vmem:[#allocation2 + $0x148] sm:$0xff]  ;;  %v246_v62 = vld [vmem:[#allocation2 + $0x140] sm:$0xff]  ;;  %v245_v63 = vld [vmem:[#allocation2 + $0x138] sm:$0xff] }
  0x1c   :  { %1198 = vmatpush3.msra.mxu0 %v43_v7  ;;  %1230 = vmatprep.subr.mxu1 %v1581_v0  ;;  %v244_v1 = vld [vmem:[#allocation2 + $0x130] sm:$0xff]  ;;  %v243_v2 = vld [vmem:[#allocation2 + $0x128] sm:$0xff]  ;;  %v242_v3 = vld [vmem:[#allocation2 + $0x120] sm:$0xff] }
  0x1d   :  { %1199 = vmatprep.subr.mxu0 %v1581_v0  ;;  %1231 = vmatpush3.msra.mxu1 %v156_v40  ;;  %v241_v4 = vld [vmem:[#allocation2 + $0x118] sm:$0xff]  ;;  %v340_v18 = vld [vmem:[#allocation2 + $0x1d0] sm:$0xff]  ;;  %v339_v19 = vld [vmem:[#allocation2 + $0x1c8] sm:$0xff] }
  0x1e   :  { %1200 = vmatpush3.msra.mxu0 %v42_v8  ;;  %1232 = vmatprep.subr.mxu1 %v1581_v0  ;;  %v333_v25 = vld [vmem:[#allocation2 + $0x198] sm:$0xff]  ;;  %v1006_v35 = vld [vmem:[#allocation2 + $0x502] ss:$0 sm:$0xff]  ;;  %vm33_vm4 = vmand %vm31_vm2, %vm32_vm3 }
  0x1f   :  { %1201 = vmatprep.subr.mxu0 %v1581_v0  ;;  %1233 = vmatpush3.msra.mxu1 %v155_v45  ;;  %v451_v40 = vld [vmem:[#allocation2 + $0x278] sm:$0xff]  ;;  %v446_v45 = vld [vmem:[#allocation2 + $0x250] sm:$0xff]  ;;  %v811_v28 = vld [vmem:[#allocation2 + $0x400] sm:$0xff] }
  0x20   :  { %1202 = vmatpush3.msra.mxu0 %v41_v9  ;;  %1234 = vmatprep.subr.mxu1 %v1581_v0 }
  0x21   :  { %1203 = vmatprep.subr.mxu0 %v1581_v0  ;;  %1235 = vmatpush3.msra.mxu1 %v154_v46  ;;  %v445_v46 = vld [vmem:[#allocation2 + $0x248] sm:$0xff] }
  0x22   :  { %1204 = vmatpush3.msra.mxu0 %v40_v10  ;;  %1236 = vmatprep.subr.mxu1 %v1581_v0  ;;  %v240_v10 = vld [vmem:[#allocation2 + $0x110] sm:$0xff] }
  0x23   :  { %1205 = vmatprep.subr.mxu0 %v1581_v0  ;;  %v1541_v20 = vpop.eup %1540  ;;  %1237 = vmatpush3.msra.mxu1 %v153_v47  ;;  %v444_v47 = vld [vmem:[#allocation2 + $0x240] sm:$0xff] }
  0x24   :  { %1206 = vmatpush3.msra.mxu0 %v39_v11  ;;  %v127_v21 = vmul.f32 0.6931472, %v1541_v20  ;;  %1238 = vmatprep.subr.mxu1 %v1581_v0  ;;  %v239_v11 = vld [vmem:[#allocation2 + $0x108] sm:$0xff]  ;;  %v338_v20 = vld [vmem:[#allocation2 + $0x1c0] sm:$0xff] }
  0x25   :  { %1207 = vmatprep.subr.mxu0 %v1581_v0  ;;  %1239 = vmatpush3.msra.mxu1 %v152_v48  ;;  %v443_v48 = vld [vmem:[#allocation2 + $0x238] sm:$0xff] }
  0x26   :  { %1208 = vmatpush3.msra.mxu0 %v38_v12  ;;  %v128_v22 = vsub.f32 0.0, %v127_v21  ;;  %1240 = vmatprep.subr.mxu1 %v1581_v0  ;;  %v238_v12 = vld [vmem:[#allocation2 + $0x100] sm:$0xff]  ;;  %v337_v21 = vld [vmem:[#allocation2 + $0x1b8] sm:$0xff] }
  0x27   :  { %1209 = vmatprep.subr.mxu0 %v1581_v0  ;;  %1241 = vmatpush3.msra.mxu1 %v151_v49  ;;  %v442_v49 = vld [vmem:[#allocation2 + $0x230] sm:$0xff] }
  0x28   :  { %1210 = vmatpush3.msra.mxu0 %v37_v13  ;;  %v129_v23 = vadd.f32 1e-20, %v128_v22  ;;  %1242 = vmatprep.subr.mxu1 %v1581_v0  ;;  %v345_v13 = vld [vmem:[#allocation2 + $0x1f8] sm:$0xff]  ;;  %v336_v22 = vld [vmem:[#allocation2 + $0x1b0] sm:$0xff] }
  0x29   :  { %1211 = vmatprep.subr.mxu0 %v1581_v0  ;;  %1243 = vmatpush3.msra.mxu1 %v150_v50  ;;  %v441_v50 = vld [vmem:[#allocation2 + $0x228] sm:$0xff] }
  0x2a   :  { %1212 = vmatpush3.msra.mxu0 %v36_v14  ;;  %1542 = vlog2.f32 %v129_v23  ;;  %1244 = vmatprep.subr.mxu1 %v1581_v0  ;;  %v344_v14 = vld [vmem:[#allocation2 + $0x1f0] sm:$0xff]  ;;  %v335_v23 = vld [vmem:[#allocation2 + $0x1a8] sm:$0xff] }
  0x2b   :  { %1213 = vmatprep.subr.mxu0 %v1581_v0  ;;  %1245 = vmatpush3.msra.mxu1 %v149_v51  ;;  %v440_v51 = vld [vmem:[#allocation2 + $0x220] sm:$0xff] }
  0x2c   :  { %1214 = vmatpush3.msra.mxu0 %v35_v15  ;;  %1246 = vmatprep.subr.mxu1 %v1581_v0  ;;  %v343_v15 = vld [vmem:[#allocation2 + $0x1e8] sm:$0xff] }
  0x2d   :  { %1215 = vmatprep.subr.mxu0 %v1581_v0  ;;  %1247 = vmatpush3.msra.mxu1 %v148_v52  ;;  %v439_v52 = vld [vmem:[#allocation2 + $0x218] sm:$0xff] }
  0x2e   :  { %1216 = vmatpush3.msra.mxu0 %v34_v16  ;;  %1248 = vmatprep.subr.mxu1 %v1581_v0  ;;  %v342_v16 = vld [vmem:[#allocation2 + $0x1e0] sm:$0xff] }
  0x2f   :  { %1218 = vmatmul.mubr.f32.vlgmr.msra.gmra.mxu0 %v1624_v17  ;;  %1255 = vmatprep.subr.mxu0 %v1581_v0 }
  0x30   :  { %1287 = vmatprep.mubr.msk.f32.mxu0 %vm1582_vm0, %v1581_v0  ;;  %1249 = vmatpush3.msra.mxu1 %v147_v53  ;;  %v438_v53 = vld [vmem:[#allocation2 + $0x210] sm:$0xff] }
  0x31   :  { %1250 = vmatprep.subr.mxu1 %v1581_v0  ;;  %1256 = vmatpush3.msra.mxu0 %v253_v55  ;;  %v436_v55 = vld [vmem:[#allocation2 + $0x200] sm:$0xff] }
  0x32   :  { %1251 = vmatpush3.msra.mxu1 %v146_v54  ;;  %1257 = vmatprep.subr.mxu0 %v1581_v0  ;;  %v437_v54 = vld [vmem:[#allocation2 + $0x208] sm:$0xff] }
  0x33   :  { %1290 = vmatprep.subr.mxu1 %v1581_v0  ;;  %1258 = vmatpush3.msra.mxu0 %v252_v56  ;;  %v543_v56 = vld [vmem:[#allocation2 + $0x2f8] sm:$0xff] }
  0x34   :  { %1259 = vmatprep.subr.mxu0 %v1581_v0 }
  0x35   :  { %1260 = vmatpush3.msra.mxu0 %v251_v57  ;;  %v542_v57 = vld [vmem:[#allocation2 + $0x2f0] sm:$0xff] }
  0x36   :  { %1261 = vmatprep.subr.mxu0 %v1581_v0 }
  0x37   :  { %v1543_v24 = vpop.eup %1542  ;;  %1262 = vmatpush3.msra.mxu0 %v250_v58  ;;  %v541_v58 = vld [vmem:[#allocation2 + $0x2e8] sm:$0xff] }
  0x38   :  { %v131_v26 = vmul.f32 0.6931472, %v1543_v24  ;;  %1263 = vmatprep.subr.mxu0 %v1581_v0  ;;  %v334_v24 = vld [vmem:[#allocation2 + $0x1a0] sm:$0xff] }
  0x39   :  { %1264 = vmatpush3.msra.mxu0 %v249_v59  ;;  %v540_v59 = vld [vmem:[#allocation2 + $0x2e0] sm:$0xff] }
  0x3a   :  { %v132_v29 = vsub.f32 0.0, %v131_v26  ;;  %1265 = vmatprep.subr.mxu0 %v1581_v0  ;;  %v1005_v26 = vld [vmem:[#allocation2 + $0x501] ss:$0 sm:$0xff] }
  0x3b   :  { %1266 = vmatpush3.msra.mxu0 %v248_v60  ;;  %v539_v60 = vld [vmem:[#allocation2 + $0x2d8] sm:$0xff] }
  0x3c   :  { %1267 = vmatprep.subr.mxu0 %v1581_v0 }
  0x3d   :  { %1268 = vmatpush3.msra.mxu0 %v247_v61  ;;  %v538_v61 = vld [vmem:[#allocation2 + $0x2d0] sm:$0xff] }
  0x3e   :  { %1269 = vmatprep.subr.mxu0 %v1581_v0 }
  0x3f   :  { %1270 = vmatpush3.msra.mxu0 %v246_v62  ;;  %v537_v62 = vld [vmem:[#allocation2 + $0x2c8] sm:$0xff] }
  0x40   :  { %1271 = vmatprep.subr.mxu0 %v1581_v0 }
  0x41   :  { %1272 = vmatpush3.msra.mxu0 %v245_v63  ;;  %v536_v63 = vld [vmem:[#allocation2 + $0x2c0] sm:$0xff] }
  0x42   :  { %1273 = vmatprep.subr.mxu0 %v1581_v0 }
  0x43   :  { %1274 = vmatpush3.msra.mxu0 %v244_v1  ;;  %v535_v1 = vld [vmem:[#allocation2 + $0x2b8] sm:$0xff] }
  0x44   :  { %1275 = vmatprep.subr.mxu0 %v1581_v0 }
  0x45   :  { %1276 = vmatpush3.msra.mxu0 %v243_v2  ;;  %v534_v2 = vld [vmem:[#allocation2 + $0x2b0] sm:$0xff] }
  0x46   :  { %1277 = vmatprep.subr.mxu0 %v1581_v0 }
  0x47   :  { %1278 = vmatpush3.msra.mxu0 %v242_v3  ;;  %v533_v3 = vld [vmem:[#allocation2 + $0x2a8] sm:$0xff] }
  0x48   :  { %1279 = vmatprep.subr.mxu0 %v1581_v0 }
  0x49   :  { %1280 = vmatpush3.msra.mxu0 %v241_v4  ;;  %v532_v4 = vld [vmem:[#allocation2 + $0x2a0] sm:$0xff] }
  0x4a   :  { %1281 = vmatprep.subr.mxu0 %v1581_v0 }
  0x4b   :  { %1282 = vmatpush3.msra.mxu0 %v240_v10 }
  0x4c   :  { %1283 = vmatprep.subr.mxu0 %v1581_v0 }
  0x4d   :  { %1284 = vmatpush3.msra.mxu0 %v239_v11 }
  0x4e   :  { %1285 = vmatprep.subr.mxu0 %v1581_v0 }
  0x4f   :  { %1286 = vmatpush3.msra.mxu0 %v238_v12 }
  0x50   :  { %1325 = vmatprep.subr.mxu0 %v1581_v0 }
  0xef   :  { %v121_v30 = vpop.f32.mrf.mxu0 }
  0xf0   :  { %v122_v31 = vadd.f32 %v1004_v27, %v121_v30 }
  0xf1   :  { %v1219_v32 = vpop.f32.mrf.mxu0 }
  0xf2   :  { %997 = vst [vmem:[%s1832_s2 + $0x18] sm:$0xff] %v122_v31  ;;  %v133_v33 = vadd.f32 %v132_v29, %v122_v31  ;;  %v332_v32 = vld [vmem:[#allocation2 + $0x190] sm:$0xff] }
  0xf4   :  { %v134_v34 = vsel %vm30_vm1, %v133_v33, -1e+30  ;;  %v331_v33 = vld [vmem:[#allocation2 + $0x188] sm:$0xff] }
  0xf5   :  { %135 = vmax.xlane.f32.xlu0 %v134_v34 }
 0x17e   :  { %v136_v41 = vpop.xlane.xlu0 %135 }
 0x17f   :  { %v137_v42 = vsub.f32 %v134_v34, %v136_v41  ;;  %v330_v34 = vld [vmem:[#allocation2 + $0x180] sm:$0xff]  ;;  %v450_v41 = vld [vmem:[#allocation2 + $0x270] sm:$0xff] }
 0x181   :  { %v138_v43 = vmul.f32 1.442695, %v137_v42  ;;  %v449_v42 = vld [vmem:[#allocation2 + $0x268] sm:$0xff] }
 0x183   :  { %1544 = vpow2.f32 %v138_v43  ;;  %v448_v43 = vld [vmem:[#allocation2 + $0x260] sm:$0xff] }
 0x190   :  { %v1648_v44 = vpop.eup %1544 }
 0x191   :  { %140 = vadd.xlane.f32.xlu0 %v1648_v44 }
 0x21a   :  { %v141_v5 = vpop.xlane.xlu0 %140 }
 0x21b   :  { %1546 = vrcp.f32 %v141_v5  ;;  %v531_v5 = vld [vmem:[#allocation2 + $0x298] sm:$0xff] }
 0x228   :  { %v1547_v6 = vpop.eup %1546 }
 0x229   :  { %v143_v7 = vmul.f32 %v1547_v6, %v1648_v44  ;;  %v447_v44 = vld [vmem:[#allocation2 + $0x258] sm:$0xff]  ;;  %v1007_v6 = vld [vmem:[#allocation2 + $0x503] ss:$0 sm:$0xff] }
 0x22b   :  { %v1677_v8 = vsel %vm30_vm1, %v143_v7, 0.0 }
 0x22c   :  { %v145_v9 = vadd.f32 %v1677_v8, %v1624_v17  ;;  %998 = vst [vmem:[%s1832_s2 + $0x20] sm:$0xff] %v1677_v8  ;;  %v341_v17 = vld [vmem:[#allocation2 + $0x1d8] sm:$0xff] }
 0x22e   :  { %1253 = vmatmul.mubr.f32.vlgmr.msra.gmra.mxu1 %v145_v9 }
 0x22f   :  { %1322 = vmatprep.mubr.msk.f32.mxu1 %vm1582_vm0, %v1581_v0  ;;  %1291 = vmatpush3.msra.mxu1 %v345_v13 }
 0x230   :  { %1292 = vmatprep.subr.mxu1 %v1581_v0 }
 0x231   :  { %1293 = vmatpush3.msra.mxu1 %v344_v14 }
 0x232   :  { %1294 = vmatprep.subr.mxu1 %v1581_v0 }
 0x233   :  { %1295 = vmatpush3.msra.mxu1 %v343_v15 }
 0x234   :  { %1296 = vmatprep.subr.mxu1 %v1581_v0 }
 0x235   :  { %1297 = vmatpush3.msra.mxu1 %v342_v16 }
 0x236   :  { %1298 = vmatprep.subr.mxu1 %v1581_v0 }
 0x237   :  { %1299 = vmatpush3.msra.mxu1 %v341_v17 }
 0x238   :  { %1300 = vmatprep.subr.mxu1 %v1581_v0 }
 0x239   :  { %1301 = vmatpush3.msra.mxu1 %v340_v18 }
 0x23a   :  { %1302 = vmatprep.subr.mxu1 %v1581_v0 }
 0x23b   :  { %1303 = vmatpush3.msra.mxu1 %v339_v19  ;;  %v27_v19 = vld [vmem:[%s1830_s0 + $0x10] sm:$0xff] }
 0x23c   :  { %1304 = vmatprep.subr.mxu1 %v1581_v0 }
 0x23d   :  { %1305 = vmatpush3.msra.mxu1 %v338_v20 }
 0x23e   :  { %1306 = vmatprep.subr.mxu1 %v1581_v0 }
 0x23f   :  { %1307 = vmatpush3.msra.mxu1 %v337_v21 }
 0x240   :  { %1308 = vmatprep.subr.mxu1 %v1581_v0 }
 0x241   :  { %1309 = vmatpush3.msra.mxu1 %v336_v22 }
 0x242   :  { %1310 = vmatprep.subr.mxu1 %v1581_v0 }
 0x243   :  { %1311 = vmatpush3.msra.mxu1 %v335_v23 }
 0x244   :  { %1312 = vmatprep.subr.mxu1 %v1581_v0 }
 0x245   :  { %1313 = vmatpush3.msra.mxu1 %v334_v24 }
 0x246   :  { %1314 = vmatprep.subr.mxu1 %v1581_v0 }
 0x247   :  { %1315 = vmatpush3.msra.mxu1 %v333_v25  ;;  %v530_v25 = vld [vmem:[#allocation2 + $0x290] sm:$0xff] }
 0x248   :  { %1316 = vmatprep.subr.mxu1 %v1581_v0 }
 0x249   :  { %1317 = vmatpush3.msra.mxu1 %v332_v32  ;;  %v632_v32 = vld [vmem:[#allocation2 + $0x360] sm:$0xff] }
 0x24a   :  { %1318 = vmatprep.subr.mxu1 %v1581_v0 }
 0x24b   :  { %1319 = vmatpush3.msra.mxu1 %v331_v33  ;;  %v631_v33 = vld [vmem:[#allocation2 + $0x358] sm:$0xff] }
 0x24c   :  { %1320 = vmatprep.subr.mxu1 %v1581_v0 }
 0x24d   :  { %1321 = vmatpush3.msra.mxu1 %v330_v34  ;;  %v630_v34 = vld [vmem:[#allocation2 + $0x350] sm:$0xff] }
 0x24e   :  { %1360 = vmatprep.subr.mxu1 %v1581_v0 }
 0x2ee   :  { %v233_v27 = vpop.f32.mrf.mxu1 }
 0x2ef   :  { %v234_v29 = vadd.f32 %v1005_v26, %v233_v27  ;;  %v529_v26 = vld [vmem:[#allocation2 + $0x288] sm:$0xff]  ;;  %v528_v27 = vld [vmem:[#allocation2 + $0x280] sm:$0xff] }
 0x2f0   :  { %v1254_v30 = vpop.f32.mrf.mxu1 }
 0x2f1   :  { %v237_v31 = vmax.f32 %v234_v29, 0.0  ;;  %v635_v29 = vld [vmem:[#allocation2 + $0x378] sm:$0xff]  ;;  %v634_v30 = vld [vmem:[#allocation2 + $0x370] sm:$0xff] }
 0x2f3   :  { %1288 = vmatmul.mubr.f32.vlgmr.msra.gmra.mxu0 %v237_v31  ;;  %v633_v31 = vld [vmem:[#allocation2 + $0x368] sm:$0xff] }
 0x2f4   :  { %1357 = vmatprep.mubr.msk.f32.mxu0 %vm1582_vm0, %v1581_v0  ;;  %1326 = vmatpush3.msra.mxu0 %v451_v40  ;;  %v624_v40 = vld [vmem:[#allocation2 + $0x320] sm:$0xff] }
 0x2f5   :  { %1327 = vmatprep.subr.mxu0 %v1581_v0 }
 0x2f6   :  { %1328 = vmatpush3.msra.mxu0 %v450_v41  ;;  %v623_v41 = vld [vmem:[#allocation2 + $0x318] sm:$0xff] }
 0x2f7   :  { %1329 = vmatprep.subr.mxu0 %v1581_v0 }
 0x2f8   :  { %1330 = vmatpush3.msra.mxu0 %v449_v42  ;;  %v1009_v42 = vld [vmem:[#allocation2 + $0x504] ss:$0 sm:$0xff] }
 0x2f9   :  { %1331 = vmatprep.subr.mxu0 %v1581_v0 }
 0x2fa   :  { %1332 = vmatpush3.msra.mxu0 %v448_v43 }
 0x2fb   :  { %1333 = vmatprep.subr.mxu0 %v1581_v0 }
 0x2fc   :  { %1334 = vmatpush3.msra.mxu0 %v447_v44 }
 0x2fd   :  { %1335 = vmatprep.subr.mxu0 %v1581_v0 }
 0x2fe   :  { %1336 = vmatpush3.msra.mxu0 %v446_v45 }
 0x2ff   :  { %1337 = vmatprep.subr.mxu0 %v1581_v0 }
 0x300   :  { %1338 = vmatpush3.msra.mxu0 %v445_v46 }
 0x301   :  { %1339 = vmatprep.subr.mxu0 %v1581_v0 }
 0x302   :  { %1340 = vmatpush3.msra.mxu0 %v444_v47  ;;  %v622_v47 = vld [vmem:[#allocation2 + $0x310] sm:$0xff] }
 0x303   :  { %1341 = vmatprep.subr.mxu0 %v1581_v0 }
 0x304   :  { %1342 = vmatpush3.msra.mxu0 %v443_v48  ;;  %v621_v48 = vld [vmem:[#allocation2 + $0x308] sm:$0xff] }
 0x305   :  { %1343 = vmatprep.subr.mxu0 %v1581_v0 }
 0x306   :  { %1344 = vmatpush3.msra.mxu0 %v442_v49  ;;  %v620_v49 = vld [vmem:[#allocation2 + $0x300] sm:$0xff] }
 0x307   :  { %1345 = vmatprep.subr.mxu0 %v1581_v0 }
 0x308   :  { %1346 = vmatpush3.msra.mxu0 %v441_v50  ;;  %v1010_v50 = vld [vmem:[#allocation2 + $0x505] ss:$0 sm:$0xff] }
 0x309   :  { %1347 = vmatprep.subr.mxu0 %v1581_v0 }
 0x30a   :  { %1348 = vmatpush3.msra.mxu0 %v440_v51 }
 0x30b   :  { %1349 = vmatprep.subr.mxu0 %v1581_v0 }
 0x30c   :  { %1350 = vmatpush3.msra.mxu0 %v439_v52 }
 0x30d   :  { %1351 = vmatprep.subr.mxu0 %v1581_v0 }
 0x30e   :  { %1352 = vmatpush3.msra.mxu0 %v438_v53 }
 0x30f   :  { %1353 = vmatprep.subr.mxu0 %v1581_v0 }
 0x310   :  { %1354 = vmatpush3.msra.mxu0 %v437_v54 }
 0x311   :  { %1355 = vmatprep.subr.mxu0 %v1581_v0 }
 0x312   :  { %1356 = vmatpush3.msra.mxu0 %v436_v55  ;;  %v734_v55 = vld [vmem:[#allocation2 + $0x3f8] sm:$0xff] }
 0x313   :  { %1395 = vmatprep.subr.mxu0 %v1581_v0 }
 0x3b3   :  { %v325_v36 = vpop.f32.mrf.mxu0 }
 0x3b4   :  { %v326_v37 = vadd.f32 %v1006_v35, %v325_v36  ;;  %v629_v35 = vld [vmem:[#allocation2 + $0x348] sm:$0xff]  ;;  %v628_v36 = vld [vmem:[#allocation2 + $0x340] sm:$0xff] }
 0x3b5   :  { %v1289_v38 = vpop.f32.mrf.mxu0 }
 0x3b6   :  { %v329_v39 = vmax.f32 %v326_v37, 0.0  ;;  %v627_v37 = vld [vmem:[#allocation2 + $0x338] sm:$0xff]  ;;  %v626_v38 = vld [vmem:[#allocation2 + $0x330] sm:$0xff] }
 0x3b8   :  { %1323 = vmatmul.mubr.f32.vlgmr.msra.gmra.mxu1 %v329_v39  ;;  %v625_v39 = vld [vmem:[#allocation2 + $0x328] sm:$0xff] }
 0x3b9   :  { %1392 = vmatprep.mubr.msk.f32.mxu1 %vm1582_vm0, %v1581_v0  ;;  %1361 = vmatpush3.msra.mxu1 %v543_v56  ;;  %v733_v56 = vld [vmem:[#allocation2 + $0x3f0] sm:$0xff] }
 0x3ba   :  { %1362 = vmatprep.subr.mxu1 %v1581_v0 }
 0x3bb   :  { %1363 = vmatpush3.msra.mxu1 %v542_v57  ;;  %v732_v57 = vld [vmem:[#allocation2 + $0x3e8] sm:$0xff] }
 0x3bc   :  { %1364 = vmatprep.subr.mxu1 %v1581_v0 }
 0x3bd   :  { %1365 = vmatpush3.msra.mxu1 %v541_v58  ;;  %v731_v58 = vld [vmem:[#allocation2 + $0x3e0] sm:$0xff] }
 0x3be   :  { %1366 = vmatprep.subr.mxu1 %v1581_v0 }
 0x3bf   :  { %1367 = vmatpush3.msra.mxu1 %v540_v59  ;;  %v730_v59 = vld [vmem:[#allocation2 + $0x3d8] sm:$0xff] }
 0x3c0   :  { %1368 = vmatprep.subr.mxu1 %v1581_v0 }
 0x3c1   :  { %1369 = vmatpush3.msra.mxu1 %v539_v60  ;;  %v729_v60 = vld [vmem:[#allocation2 + $0x3d0] sm:$0xff] }
 0x3c2   :  { %1370 = vmatprep.subr.mxu1 %v1581_v0 }
 0x3c3   :  { %1371 = vmatpush3.msra.mxu1 %v538_v61  ;;  %v728_v61 = vld [vmem:[#allocation2 + $0x3c8] sm:$0xff] }
 0x3c4   :  { %1372 = vmatprep.subr.mxu1 %v1581_v0 }
 0x3c5   :  { %1373 = vmatpush3.msra.mxu1 %v537_v62  ;;  %v727_v62 = vld [vmem:[#allocation2 + $0x3c0] sm:$0xff] }
 0x3c6   :  { %1374 = vmatprep.subr.mxu1 %v1581_v0 }
 0x3c7   :  { %1375 = vmatpush3.msra.mxu1 %v536_v63  ;;  %v726_v63 = vld [vmem:[#allocation2 + $0x3b8] sm:$0xff] }
 0x3c8   :  { %1376 = vmatprep.subr.mxu1 %v1581_v0 }
 0x3c9   :  { %1377 = vmatpush3.msra.mxu1 %v535_v1  ;;  %v725_v1 = vld [vmem:[#allocation2 + $0x3b0] sm:$0xff] }
 0x3ca   :  { %1378 = vmatprep.subr.mxu1 %v1581_v0 }
 0x3cb   :  { %1379 = vmatpush3.msra.mxu1 %v534_v2  ;;  %v724_v2 = vld [vmem:[#allocation2 + $0x3a8] sm:$0xff] }
 0x3cc   :  { %1380 = vmatprep.subr.mxu1 %v1581_v0 }
 0x3cd   :  { %1381 = vmatpush3.msra.mxu1 %v533_v3  ;;  %v723_v3 = vld [vmem:[#allocation2 + $0x3a0] sm:$0xff] }
 0x3ce   :  { %1382 = vmatprep.subr.mxu1 %v1581_v0 }
 0x3cf   :  { %1383 = vmatpush3.msra.mxu1 %v532_v4  ;;  %v722_v4 = vld [vmem:[#allocation2 + $0x398] sm:$0xff] }
 0x3d0   :  { %1384 = vmatprep.subr.mxu1 %v1581_v0 }
 0x3d1   :  { %1385 = vmatpush3.msra.mxu1 %v531_v5  ;;  %v721_v5 = vld [vmem:[#allocation2 + $0x390] sm:$0xff] }
 0x3d2   :  { %1386 = vmatprep.subr.mxu1 %v1581_v0 }
 0x3d3   :  { %1387 = vmatpush3.msra.mxu1 %v530_v25 }
 0x3d4   :  { %1388 = vmatprep.subr.mxu1 %v1581_v0 }
 0x3d5   :  { %1389 = vmatpush3.msra.mxu1 %v529_v26 }
 0x3d6   :  { %1390 = vmatprep.subr.mxu1 %v1581_v0 }
 0x3d7   :  { %1391 = vmatpush3.msra.mxu1 %v528_v27 }
 0x3d8   :  { %1430 = vmatprep.subr.mxu1 %v1581_v0 }
 0x478   :  { %v417_v7 = vpop.f32.mrf.mxu1 }
 0x479   :  { %v418_v9 = vadd.f32 %v1007_v6, %v417_v7  ;;  %v720_v6 = vld [vmem:[#allocation2 + $0x388] sm:$0xff]  ;;  %v719_v7 = vld [vmem:[#allocation2 + $0x380] sm:$0xff] }
 0x47a   :  { %v1324_v10 = vpop.f32.mrf.mxu1 }
 0x47b   :  { %v422_v11 = vmin.f32 %v418_v9, 0.0  ;;  %vm421_vm5 = vcmp.gt.f32.partialorder %v418_v9, 0.0  ;;  %v825_v10 = vld [vmem:[#allocation2 + $0x470] sm:$0xff] }
 0x47d   :  { %v423_v12 = vmul.f32 1.442695, %v422_v11  ;;  %v824_v11 = vld [vmem:[#allocation2 + $0x468] sm:$0xff] }
 0x47f   :  { %1548 = vpow2.f32 %v423_v12  ;;  %v823_v12 = vld [vmem:[#allocation2 + $0x460] sm:$0xff] }
 0x48c   :  { %v1549_v13 = vpop.eup %1548 }
 0x48d   :  { %v1008_v14 = vadd.f32 -1.0, %v1549_v13  ;;  %v822_v13 = vld [vmem:[#allocation2 + $0x458] sm:$0xff] }
 0x48f   :  { %v426_v15 = vsel %vm421_vm5, %v418_v9, %v1008_v14  ;;  %v826_v9 = vld [vmem:[#allocation2 + $0x478] sm:$0xff]  ;;  %v821_v14 = vld [vmem:[#allocation2 + $0x450] sm:$0xff] }
 0x490   :  { %v427_v16 = vsel %vm33_vm4, %v426_v15, 0.0  ;;  %996 = vst [vmem:[%s1832_s2 + $0x10] sm:$0xff] %v426_v15  ;;  %v433_v22 = vsel %vm432_vm6, %v426_v15, 0.0  ;;  %v820_v15 = vld [vmem:[#allocation2 + $0x448] sm:$0xff] }
 0x491   :  { %v428_v17 = vmul.f32 0.5, %v427_v16  ;;  %v819_v16 = vld [vmem:[#allocation2 + $0x440] sm:$0xff] }
 0x493   :  { %v429_v18 = vmul.f32 1.442695, %v428_v17  ;;  %v818_v17 = vld [vmem:[#allocation2 + $0x438] sm:$0xff] }
 0x495   :  { %1550 = vpow2.f32 %v429_v18  ;;  %v817_v18 = vld [vmem:[#allocation2 + $0x430] sm:$0xff] }
 0x4a2   :  { %v1551_v20 = vpop.eup %1550 }
 0x4a3   :  { %v431_v21 = vmul.f32 %v1551_v20, %v27_v19  ;;  %v816_v19 = vld [vmem:[#allocation2 + $0x428] sm:$0xff]  ;;  %v815_v20 = vld [vmem:[#allocation2 + $0x420] sm:$0xff] }
 0x4a5   :  { %v434_v23 = vadd.f32 %v433_v22, %v431_v21  ;;  %v814_v21 = vld [vmem:[#allocation2 + $0x418] sm:$0xff]  ;;  %v1011_v22 = vld [vmem:[#allocation2 + $0x506] ss:$0 sm:$0xff] }
 0x4a7   :  { %v435_v24 = vadd.f32 %v434_v23, %v1677_v8 }
 0x4a9   :  { %1358 = vmatmul.mubr.f32.vlgmr.msra.gmra.mxu0 %v435_v24 }
 0x4aa   :  { %1427 = vmatprep.mubr.msk.f32.mxu0 %vm1582_vm0, %v1581_v0  ;;  %1396 = vmatpush3.msra.mxu0 %v635_v29 }
 0x4ab   :  { %1397 = vmatprep.subr.mxu0 %v1581_v0 }
 0x4ac   :  { %1398 = vmatpush3.msra.mxu0 %v634_v30 }
 0x4ad   :  { %1399 = vmatprep.subr.mxu0 %v1581_v0 }
 0x4ae   :  { %1400 = vmatpush3.msra.mxu0 %v633_v31 }
 0x4af   :  { %1401 = vmatprep.subr.mxu0 %v1581_v0 }
 0x4b0   :  { %1402 = vmatpush3.msra.mxu0 %v632_v32 }
 0x4b1   :  { %1403 = vmatprep.subr.mxu0 %v1581_v0 }
 0x4b2   :  { %1404 = vmatpush3.msra.mxu0 %v631_v33 }
 0x4b3   :  { %1405 = vmatprep.subr.mxu0 %v1581_v0 }
 0x4b4   :  { %1406 = vmatpush3.msra.mxu0 %v630_v34  ;;  %v813_v34 = vld [vmem:[#allocation2 + $0x410] sm:$0xff] }
 0x4b5   :  { %1407 = vmatprep.subr.mxu0 %v1581_v0 }
 0x4b6   :  { %1408 = vmatpush3.msra.mxu0 %v629_v35  ;;  %v812_v35 = vld [vmem:[#allocation2 + $0x408] sm:$0xff] }
 0x4b7   :  { %1409 = vmatprep.subr.mxu0 %v1581_v0 }
 0x4b8   :  { %1410 = vmatpush3.msra.mxu0 %v628_v36  ;;  %v918_v36 = vld [vmem:[#allocation2 + $0x4f8] sm:$0xff] }
 0x4b9   :  { %1411 = vmatprep.subr.mxu0 %v1581_v0 }
 0x4ba   :  { %1412 = vmatpush3.msra.mxu0 %v627_v37  ;;  %v916_v37 = vld [vmem:[#allocation2 + $0x4e8] sm:$0xff] }
 0x4bb   :  { %1413 = vmatprep.subr.mxu0 %v1581_v0 }
 0x4bc   :  { %1414 = vmatpush3.msra.mxu0 %v626_v38  ;;  %v915_v38 = vld [vmem:[#allocation2 + $0x4e0] sm:$0xff] }
 0x4bd   :  { %1415 = vmatprep.subr.mxu0 %v1581_v0 }
 0x4be   :  { %1416 = vmatpush3.msra.mxu0 %v625_v39  ;;  %v914_v39 = vld [vmem:[#allocation2 + $0x4d8] sm:$0xff] }
 0x4bf   :  { %1417 = vmatprep.subr.mxu0 %v1581_v0 }
 0x4c0   :  { %1418 = vmatpush3.msra.mxu0 %v624_v40  ;;  %v913_v40 = vld [vmem:[#allocation2 + $0x4d0] sm:$0xff] }
 0x4c1   :  { %1419 = vmatprep.subr.mxu0 %v1581_v0 }
 0x4c2   :  { %1420 = vmatpush3.msra.mxu0 %v623_v41  ;;  %v912_v41 = vld [vmem:[#allocation2 + $0x4c8] sm:$0xff] }
 0x4c3   :  { %1421 = vmatprep.subr.mxu0 %v1581_v0 }
 0x4c4   :  { %1422 = vmatpush3.msra.mxu0 %v622_v47  ;;  %v906_v47 = vld [vmem:[#allocation2 + $0x498] sm:$0xff] }
 0x4c5   :  { %1423 = vmatprep.subr.mxu0 %v1581_v0 }
 0x4c6   :  { %1424 = vmatpush3.msra.mxu0 %v621_v48  ;;  %v1012_v48 = vld [vmem:[#allocation2 + $0x507] ss:$0 sm:$0xff] }
 0x4c7   :  { %1425 = vmatprep.subr.mxu0 %v1581_v0 }
 0x4c8   :  { %1426 = vmatpush3.msra.mxu0 %v620_v49 }
 0x4c9   :  { %1465 = vmatprep.subr.mxu0 %v1581_v0 }
 0x569   :  { %v523_v43 = vpop.f32.mrf.mxu0 }
 0x56a   :  { %v524_v44 = vadd.f32 %v1009_v42, %v523_v43  ;;  %v911_v42 = vld [vmem:[#allocation2 + $0x4c0] sm:$0xff]  ;;  %v910_v43 = vld [vmem:[#allocation2 + $0x4b8] sm:$0xff] }
 0x56b   :  { %v1359_v45 = vpop.f32.mrf.mxu0 }
 0x56c   :  { %v527_v46 = vmax.f32 %v524_v44, 0.0  ;;  %v909_v44 = vld [vmem:[#allocation2 + $0x4b0] sm:$0xff]  ;;  %v908_v45 = vld [vmem:[#allocation2 + $0x4a8] sm:$0xff] }
 0x56e   :  { %1393 = vmatmul.mubr.f32.vlgmr.msra.gmra.mxu1 %v527_v46  ;;  %v907_v46 = vld [vmem:[#allocation2 + $0x4a0] sm:$0xff] }
 0x56f   :  { %1462 = vmatprep.mubr.msk.f32.mxu1 %vm1582_vm0, %v1581_v0  ;;  %1431 = vmatpush3.msra.mxu1 %v734_v55  ;;  %v903_v55 = vld [vmem:[#allocation2 + $0x480] sm:$0xff] }
 0x570   :  { %1432 = vmatprep.subr.mxu1 %v1581_v0 }
 0x571   :  { %1433 = vmatpush3.msra.mxu1 %v733_v56  ;;  %v1013_v56 = vld [vmem:[#allocation2 + $0x508] ss:$0 sm:$0xff] }
 0x572   :  { %1434 = vmatprep.subr.mxu1 %v1581_v0 }
 0x573   :  { %1435 = vmatpush3.msra.mxu1 %v732_v57 }
 0x574   :  { %1436 = vmatprep.subr.mxu1 %v1581_v0 }
 0x575   :  { %1437 = vmatpush3.msra.mxu1 %v731_v58 }
 0x576   :  { %1438 = vmatprep.subr.mxu1 %v1581_v0 }
 0x577   :  { %1439 = vmatpush3.msra.mxu1 %v730_v59 }
 0x578   :  { %1440 = vmatprep.subr.mxu1 %v1581_v0 }
 0x579   :  { %1441 = vmatpush3.msra.mxu1 %v729_v60 }
 0x57a   :  { %1442 = vmatprep.subr.mxu1 %v1581_v0 }
 0x57b   :  { %1443 = vmatpush3.msra.mxu1 %v728_v61  ;;  %v1014_v61 = vld [vmem:[#allocation2 + $0x509] ss:$0 sm:$0xff] }
 0x57c   :  { %1444 = vmatprep.subr.mxu1 %v1581_v0 }
 0x57d   :  { %1445 = vmatpush3.msra.mxu1 %v727_v62 }
 0x57e   :  { %1446 = vmatprep.subr.mxu1 %v1581_v0 }
 0x57f   :  { %1447 = vmatpush3.msra.mxu1 %v726_v63 }
 0x580   :  { %1448 = vmatprep.subr.mxu1 %v1581_v0 }
 0x581   :  { %1449 = vmatpush3.msra.mxu1 %v725_v1 }
 0x582   :  { %1450 = vmatprep.subr.mxu1 %v1581_v0 }
 0x583   :  { %1451 = vmatpush3.msra.mxu1 %v724_v2 }
 0x584   :  { %1452 = vmatprep.subr.mxu1 %v1581_v0 }
 0x585   :  { %1453 = vmatpush3.msra.mxu1 %v723_v3 }
 0x586   :  { %1454 = vmatprep.subr.mxu1 %v1581_v0 }
 0x587   :  { %1455 = vmatpush3.msra.mxu1 %v722_v4 }
 0x588   :  { %1456 = vmatprep.subr.mxu1 %v1581_v0 }
 0x589   :  { %1457 = vmatpush3.msra.mxu1 %v721_v5 }
 0x58a   :  { %1458 = vmatprep.subr.mxu1 %v1581_v0 }
 0x58b   :  { %1459 = vmatpush3.msra.mxu1 %v720_v6 }
 0x58c   :  { %1460 = vmatprep.subr.mxu1 %v1581_v0 }
 0x58d   :  { %1461 = vmatpush3.msra.mxu1 %v719_v7 }
 0x58e   :  { %1500 = vmatprep.subr.mxu1 %v1581_v0 }
 0x62e   :  { %v615_v51 = vpop.f32.mrf.mxu1 }
 0x62f   :  { %v616_v52 = vadd.f32 %v1010_v50, %v615_v51 }
 0x630   :  { %v1394_v53 = vpop.f32.mrf.mxu1 }
 0x631   :  { %v619_v54 = vmax.f32 %v616_v52, 0.0  ;;  %v905_v53 = vld [vmem:[#allocation2 + $0x490] sm:$0xff] }
 0x633   :  { %1428 = vmatmul.mubr.f32.vlgmr.msra.gmra.mxu0 %v619_v54  ;;  %v904_v54 = vld [vmem:[#allocation2 + $0x488] sm:$0xff] }
 0x634   :  { %1497 = vmatprep.mubr.msk.f32.mxu0 %vm1582_vm0, %v1581_v0  ;;  %1466 = vmatpush3.msra.mxu0 %v826_v9 }
 0x635   :  { %1467 = vmatprep.subr.mxu0 %v1581_v0 }
 0x636   :  { %1468 = vmatpush3.msra.mxu0 %v825_v10 }
 0x637   :  { %1469 = vmatprep.subr.mxu0 %v1581_v0 }
 0x638   :  { %1470 = vmatpush3.msra.mxu0 %v824_v11 }
 0x639   :  { %1471 = vmatprep.subr.mxu0 %v1581_v0 }
 0x63a   :  { %1472 = vmatpush3.msra.mxu0 %v823_v12 }
 0x63b   :  { %1473 = vmatprep.subr.mxu0 %v1581_v0 }
 0x63c   :  { %1474 = vmatpush3.msra.mxu0 %v822_v13 }
 0x63d   :  { %1475 = vmatprep.subr.mxu0 %v1581_v0 }
 0x63e   :  { %1476 = vmatpush3.msra.mxu0 %v821_v14 }
 0x63f   :  { %1477 = vmatprep.subr.mxu0 %v1581_v0 }
 0x640   :  { %1478 = vmatpush3.msra.mxu0 %v820_v15 }
 0x641   :  { %1479 = vmatprep.subr.mxu0 %v1581_v0 }
 0x642   :  { %1480 = vmatpush3.msra.mxu0 %v819_v16 }
 0x643   :  { %1481 = vmatprep.subr.mxu0 %v1581_v0 }
 0x644   :  { %1482 = vmatpush3.msra.mxu0 %v818_v17 }
 0x645   :  { %1483 = vmatprep.subr.mxu0 %v1581_v0 }
 0x646   :  { %1484 = vmatpush3.msra.mxu0 %v817_v18 }
 0x647   :  { %1485 = vmatprep.subr.mxu0 %v1581_v0 }
 0x648   :  { %1486 = vmatpush3.msra.mxu0 %v816_v19 }
 0x649   :  { %1487 = vmatprep.subr.mxu0 %v1581_v0 }
 0x64a   :  { %1488 = vmatpush3.msra.mxu0 %v815_v20 }
 0x64b   :  { %1489 = vmatprep.subr.mxu0 %v1581_v0 }
 0x64c   :  { %1490 = vmatpush3.msra.mxu0 %v814_v21 }
 0x64d   :  { %1491 = vmatprep.subr.mxu0 %v1581_v0 }
 0x64e   :  { %1492 = vmatpush3.msra.mxu0 %v813_v34 }
 0x64f   :  { %1493 = vmatprep.subr.mxu0 %v1581_v0 }
 0x650   :  { %1494 = vmatpush3.msra.mxu0 %v812_v35 }
 0x651   :  { %1495 = vmatprep.subr.mxu0 %v1581_v0 }
 0x652   :  { %1496 = vmatpush3.msra.mxu0 %v811_v28 }
 0x6f3   :  { %v707_v23 = vpop.f32.mrf.mxu0 }
 0x6f4   :  { %v708_v24 = vadd.f32 %v1011_v22, %v707_v23 }
 0x6f5   :  { %v1429_v25 = vpop.f32.mrf.mxu0 }
 0x6f6   :  { %v711_v26 = vsub.f32 0.0, %v708_v24 }
 0x6f8   :  { %v712_v27 = vmul.f32 1.442695, %v711_v26 }
 0x6fa   :  { %1552 = vpow2.f32 %v712_v27 }
 0x707   :  { %v1553_v29 = vpop.eup %1552 }
 0x708   :  { %v714_v30 = vadd.f32 1.0, %v1553_v29 }
 0x70a   :  { %1554 = vrcp.f32 %v714_v30 }
 0x717   :  { %v1555_v31 = vpop.eup %1554 }
 0x718   :  { %v717_v32 = vsel %vm716_vm7, %v1555_v31, 0.0 }
 0x719   :  { %v718_v33 = vadd.f32 %v717_v32, %v1677_v8  ;;  %994 = vst [vmem:[%s1832_s2] sm:$0xff] %v717_v32  ;;  %v917_v8 = vld [vmem:[#allocation2 + $0x4f0] sm:$0xff] }
 0x71b   :  { %1463 = vmatmul.mubr.f32.vlgmr.msra.gmra.mxu1 %v718_v33 }
 0x71c   :  { %1532 = vmatprep.mubr.msk.f32.mxu1 %vm1582_vm0, %v1581_v0  ;;  %1501 = vmatpush3.msra.mxu1 %v918_v36 }
 0x71d   :  { %1502 = vmatprep.subr.mxu1 %v1581_v0 }
 0x71e   :  { %1503 = vmatpush3.msra.mxu1 %v917_v8 }
 0x71f   :  { %1504 = vmatprep.subr.mxu1 %v1581_v0 }
 0x720   :  { %1505 = vmatpush3.msra.mxu1 %v916_v37 }
 0x721   :  { %1506 = vmatprep.subr.mxu1 %v1581_v0 }
 0x722   :  { %1507 = vmatpush3.msra.mxu1 %v915_v38 }
 0x723   :  { %1508 = vmatprep.subr.mxu1 %v1581_v0 }
 0x724   :  { %1509 = vmatpush3.msra.mxu1 %v914_v39 }
 0x725   :  { %1510 = vmatprep.subr.mxu1 %v1581_v0 }
 0x726   :  { %1511 = vmatpush3.msra.mxu1 %v913_v40 }
 0x727   :  { %1512 = vmatprep.subr.mxu1 %v1581_v0 }
 0x728   :  { %1513 = vmatpush3.msra.mxu1 %v912_v41 }
 0x729   :  { %1514 = vmatprep.subr.mxu1 %v1581_v0 }
 0x72a   :  { %1515 = vmatpush3.msra.mxu1 %v911_v42 }
 0x72b   :  { %1516 = vmatprep.subr.mxu1 %v1581_v0 }
 0x72c   :  { %1517 = vmatpush3.msra.mxu1 %v910_v43 }
 0x72d   :  { %1518 = vmatprep.subr.mxu1 %v1581_v0 }
 0x72e   :  { %1519 = vmatpush3.msra.mxu1 %v909_v44 }
 0x72f   :  { %1520 = vmatprep.subr.mxu1 %v1581_v0 }
 0x730   :  { %1521 = vmatpush3.msra.mxu1 %v908_v45 }
 0x731   :  { %1522 = vmatprep.subr.mxu1 %v1581_v0 }
 0x732   :  { %1523 = vmatpush3.msra.mxu1 %v907_v46 }
 0x733   :  { %1524 = vmatprep.subr.mxu1 %v1581_v0 }
 0x734   :  { %1525 = vmatpush3.msra.mxu1 %v906_v47 }
 0x735   :  { %1526 = vmatprep.subr.mxu1 %v1581_v0 }
 0x736   :  { %1527 = vmatpush3.msra.mxu1 %v905_v53 }
 0x737   :  { %1528 = vmatprep.subr.mxu1 %v1581_v0 }
 0x738   :  { %1529 = vmatpush3.msra.mxu1 %v904_v54 }
 0x739   :  { %1530 = vmatprep.subr.mxu1 %v1581_v0 }
 0x73a   :  { %1531 = vmatpush3.msra.mxu1 %v903_v55 }
 0x7db   :  { %v806_v49 = vpop.f32.mrf.mxu1 }
 0x7dc   :  { %v807_v50 = vadd.f32 %v1012_v48, %v806_v49 }
 0x7dd   :  { %v1464_v51 = vpop.f32.mrf.mxu1 }
 0x7de   :  { %v810_v52 = vmax.f32 %v807_v50, 0.0 }
 0x7e0   :  { %1498 = vmatmul.mubr.f32.vlgmr.msra.gmra.mxu0 %v810_v52 }
 0x8a0   :  { %v898_v57 = vpop.f32.mrf.mxu0 }
 0x8a1   :  { %v899_v58 = vadd.f32 %v1013_v56, %v898_v57 }
 0x8a2   :  { %v1499_v59 = vpop.f32.mrf.mxu0 }
 0x8a3   :  { %v902_v60 = vmax.f32 %v899_v58, 0.0 }
 0x8a5   :  { %1533 = vmatmul.mubr.f32.vlgmr.msra.gmra.mxu1 %v902_v60 }
 0x965   :  { %v990_v62 = vpop.f32.mrf.mxu1 }
 0x966   :  { %v991_v63 = vadd.f32 %v1014_v61, %v990_v62 }
 0x967   :  { %v1534_v1 = vpop.f32.mrf.mxu1 }
 0x968   :  { %995 = vst [vmem:[%s1832_s2 + $0x8] sm:$0xff] %v991_v63 }
 0x969   :  { %1003 = vsyncpa [#allocation3], 1 }

</bundles_post_ra>
